<compile_context>
chip_gen: v7x
topology: tpu7x:2x2x1
jax: 0.10.0
libtpu: 0.0.40
codegen_flags: <defaults>
</compile_context>

<pallas_src>
import jax
import jax.numpy as jnp
from jax import lax
from jax.experimental import pallas as pl
from jax.experimental.pallas import tpu as pltpu

LN_EPS = 1e-5


def _round_up(n, m):
    return ((n + m - 1) // m) * m


def _mean_mlp_kernel(x_ref, w1_ref, b1_ref, g_ref, beta_ref, w2t_ref, b2_ref,
                     feat_t_ref):
    # x_ref: (Mt, C) bf16 tile of flattened [B*T, C] rows.
    x = x_ref[...]

    # Linear 1 on the MXU: bf16 x bf16 -> f32 accumulation.  [Mt, H]
    h = jnp.dot(x, w1_ref[...], preferred_element_type=jnp.float32)
    h = h + b1_ref[...]                                   # [1, H] sublane-broadcast

    # LayerNorm over the hidden (lane) dim, all f32 (v5e VPU/EUP have no bf16).
    mu = jnp.mean(h, axis=-1, keepdims=True)
    var = jnp.mean(jnp.square(h - mu), axis=-1, keepdims=True)
    hn = (h - mu) * lax.rsqrt(var + LN_EPS)
    hn = hn * g_ref[...] + beta_ref[...]

    # ReLU
    hn = jnp.maximum(hn, 0.0)

    # Dropout(p=0.49): inference-mode identity.
    # TODO(synk): training-mode dropout (pltpu.prng_random_bits mask) not emitted.

    # Linear 2, computed transposed so the output tile is lane-dense along M:
    #   out_t[c, m] = sum_h w2t[c, h] * hn[m, h]        -> [n_cls, Mt]
    out_t = lax.dot_general(
        w2t_ref[...], hn,
        dimension_numbers=(((1,), (1,)), ((), ())),
        preferred_element_type=jnp.float32)
    out_t = out_t + b2_ref[...]                           # [n_cls, 1] lane-broadcast

    feat_t_ref[...] = out_t.astype(feat_t_ref.dtype)      # full-block, unmasked store


def mean_mlp_forward(x, params, *, max_rows_per_tile=1024):
    """x: [B, T, C] float (f32 or bf16). Returns (features [B, T, n_cls], logits [B, n_cls])."""
    B, T, C = x.shape
    w1, b1, g, beta, w2, b2 = params
    H = w1.shape[1]
    n_cls = w2.shape[1]

    # Flatten the batch/time axes into one fat M axis, padded to the tile size.
    M = B * T
    m_tile = min(max_rows_per_tile, _round_up(M, 128))
    m_pad = _round_up(M, m_tile)

    # bf16 input for the first matmul (halves x's HBM traffic; ideally the caller
    # already supplies bf16 so this cast is a no-op).
    x2 = x.reshape(M, C).astype(jnp.bfloat16)
    if m_pad != M:
        x2 = jnp.pad(x2, ((0, m_pad - M), (0, 0)))

    w1_bf = w1.astype(jnp.bfloat16)                       # [C, H]
    b1_2d = b1.reshape(1, H).astype(jnp.float32)
    g_2d = g.reshape(1, H).astype(jnp.float32)
    beta_2d = beta.reshape(1, H).astype(jnp.float32)
    w2_t = jnp.transpose(w2).astype(jnp.float32)          # [n_cls, H]
    b2_col = b2.reshape(n_cls, 1).astype(jnp.float32)

    def rep(a):  # replicated (full-block) parameter spec
        return pl.BlockSpec(a.shape, lambda i: (0, 0))

    feat_t = pl.pallas_call(
        _mean_mlp_kernel,
        out_shape=jax.ShapeDtypeStruct((n_cls, m_pad), jnp.float32),
        grid_spec=pltpu.PrefetchScalarGridSpec(
            num_scalar_prefetch=0,
            grid=(m_pad // m_tile,),
            in_specs=[
                pl.BlockSpec((m_tile, C), lambda i: (i, 0)),   # x rows tile
                rep(w1_bf), rep(b1_2d), rep(g_2d),
                rep(beta_2d), rep(w2_t), rep(b2_col),
            ],
            out_specs=pl.BlockSpec((n_cls, m_tile), lambda i: (0, i)),
        ),
        compiler_params=pltpu.CompilerParams(
            dimension_semantics=("parallel",)),
    )(x2, w1_bf, b1_2d, g_2d, beta_2d, w2_t, b2_col)

    # Tiny wrapper-side layout plumbing + logits mean over T (XLA, negligible).
    feat = feat_t[:, :M].T.reshape(B, T, n_cls)
    logits = feat.mean(axis=1)
    return feat, logits


def init_params(key, num_roi, hidden_size=160, output_size=2):
    """Deterministic init mimicking nn.Linear (uniform +-1/sqrt(fan_in)) and LayerNorm."""
    k1, k2, k3, k4 = jax.random.split(key, 4)
    lim1 = 1.0 / jnp.sqrt(num_roi)
    lim2 = 1.0 / jnp.sqrt(hidden_size)
    w1 = jax.random.uniform(k1, (num_roi, hidden_size), jnp.float32, -lim1, lim1)
    b1 = jax.random.uniform(k2, (hidden_size,), jnp.float32, -lim1, lim1)
    g = jnp.ones((hidden_size,), jnp.float32)
    beta = jnp.zeros((hidden_size,), jnp.float32)
    w2 = jax.random.uniform(k3, (hidden_size, output_size), jnp.float32, -lim2, lim2)
    b2 = jax.random.uniform(k4, (output_size,), jnp.float32, -lim2, lim2)
    return (w1, b1, g, beta, w2, b2)


def reference_forward(x, params):
    """Plain-JAX reference matching the kernel's numerics (bf16 first matmul, f32 rest)."""
    w1, b1, g, beta, w2, b2 = params
    B, T, C = x.shape
    xb = x.astype(jnp.bfloat16).reshape(B * T, C)
    h = lax.dot(xb, w1.astype(jnp.bfloat16),
                preferred_element_type=jnp.float32) + b1
    mu = h.mean(-1, keepdims=True)
    var = ((h - mu) ** 2).mean(-1, keepdims=True)
    h = (h - mu) * lax.rsqrt(var + LN_EPS) * g + beta
    h = jnp.maximum(h, 0.0)
    feat = (h @ w2 + b2).reshape(B, T, -1)
    return feat, feat.mean(1)


if __name__ == "__main__":
    B, T, C = 2, 8, 16          # batch, time_length, num_roi
    key = jax.random.PRNGKey(0)
    kx, kp = jax.random.split(key)
    x = jax.random.normal(kx, (B, T, C), jnp.float32)
    params = init_params(kp, num_roi=C, hidden_size=160, output_size=2)

    feat, logits = mean_mlp_forward(x, params)
    jax.block_until_ready((feat, logits))

    ref_feat, ref_logits = reference_forward(x, params)
    assert feat.shape == (B, T, 2) and logits.shape == (B, 2)
    assert jnp.allclose(feat, ref_feat, atol=1e-3, rtol=1e-3), \
        float(jnp.max(jnp.abs(feat - ref_feat)))
    assert jnp.allclose(logits, ref_logits, atol=1e-3, rtol=1e-3), \
        float(jnp.max(jnp.abs(logits - ref_logits)))

    print("KERNEL_OK")
</pallas_src>

<mosaic_0001>
module attributes {stable_mosaic.version = 11 : i64} {
  func.func @_mean_mlp_kernel(%arg0: i32, %arg1: memref<128x16xbf16, #tpu.memory_space<vmem>>, %arg2: memref<16x160xbf16, #tpu.memory_space<vmem>>, %arg3: memref<1x160xf32, #tpu.memory_space<vmem>>, %arg4: memref<1x160xf32, #tpu.memory_space<vmem>>, %arg5: memref<1x160xf32, #tpu.memory_space<vmem>>, %arg6: memref<2x160xf32, #tpu.memory_space<vmem>>, %arg7: memref<2x1xf32, #tpu.memory_space<vmem>>, %arg8: memref<2x128xf32, #tpu.memory_space<vmem>>) attributes {dimension_semantics = [#tpu.dimension_semantics<parallel>], iteration_bounds = array<i64: 1>, scalar_prefetch = 0 : i64, scratch_operands = 0 : i64, tpu.core_type = #tpu.core_type<tc>, window_params = [{transform_indices = @transform_0, window_bounds = array<i64: 128, 16>}, {pipeline_mode = #tpu.pipeline_mode<synchronous>, transform_indices = @transform_1, window_bounds = array<i64: 16, 160>}, {pipeline_mode = #tpu.pipeline_mode<synchronous>, transform_indices = @transform_2, window_bounds = array<i64: 1, 160>}, {pipeline_mode = #tpu.pipeline_mode<synchronous>, transform_indices = @transform_3, window_bounds = array<i64: 1, 160>}, {pipeline_mode = #tpu.pipeline_mode<synchronous>, transform_indices = @transform_4, window_bounds = array<i64: 1, 160>}, {pipeline_mode = #tpu.pipeline_mode<synchronous>, transform_indices = @transform_5, window_bounds = array<i64: 2, 160>}, {pipeline_mode = #tpu.pipeline_mode<synchronous>, transform_indices = @transform_6, window_bounds = array<i64: 2, 1>}, {transform_indices = @transform_7, window_bounds = array<i64: 2, 128>}]} {
    %c0 = arith.constant 0 : index
    %c0_0 = arith.constant 0 : index
    %0 = vector.load %arg1[%c0, %c0_0] : memref<128x16xbf16, #tpu.memory_space<vmem>>, vector<128x16xbf16>
    %c0_1 = arith.constant 0 : index
    %c0_2 = arith.constant 0 : index
    %1 = vector.load %arg2[%c0_1, %c0_2] : memref<16x160xbf16, #tpu.memory_space<vmem>>, vector<16x160xbf16>
    %cst = arith.constant dense<0.000000e+00> : vector<128x160xf32>
    %2 = tpu.matmul %0, %1, %cst {dimension_numbers = #tpu.dot_dimension_numbers<[1], [0], [0], [1], [0, 0, 1, 1], [], []>} : vector<128x16xbf16>, vector<16x160xbf16>, vector<128x160xf32> -> vector<128x160xf32>
    %c0_3 = arith.constant 0 : index
    %c0_4 = arith.constant 0 : index
    %3 = vector.load %arg3[%c0_3, %c0_4] : memref<1x160xf32, #tpu.memory_space<vmem>>, vector<1x160xf32>
    %4 = vector.broadcast %3 : vector<1x160xf32> to vector<128x160xf32>
    %5 = arith.addf %2, %4 : vector<128x160xf32>
    %cst_5 = arith.constant dense<0.000000e+00> : vector<128xf32>
    %6 = vector.multi_reduction <add>, %5, %cst_5 [1] : vector<128x160xf32> to vector<128xf32>
    %7 = vector.shape_cast %6 : vector<128xf32> to vector<128x1xf32>
    %cst_6 = arith.constant 1.600000e+02 : f32
    %8 = vector.broadcast %cst_6 : f32 to vector<128x1xf32>
    %9 = arith.divf %7, %8 : vector<128x1xf32>
    %10 = vector.broadcast %9 : vector<128x1xf32> to vector<128x160xf32>
    %11 = arith.subf %5, %10 : vector<128x160xf32>
    %12 = arith.mulf %11, %11 : vector<128x160xf32>
    %cst_7 = arith.constant dense<0.000000e+00> : vector<128xf32>
    %13 = vector.multi_reduction <add>, %12, %cst_7 [1] : vector<128x160xf32> to vector<128xf32>
    %14 = vector.shape_cast %13 : vector<128xf32> to vector<128x1xf32>
    %cst_8 = arith.constant 1.600000e+02 : f32
    %15 = vector.broadcast %cst_8 : f32 to vector<128x1xf32>
    %16 = arith.divf %14, %15 : vector<128x1xf32>
    %17 = vector.broadcast %9 : vector<128x1xf32> to vector<128x160xf32>
    %18 = arith.subf %5, %17 : vector<128x160xf32>
    %cst_9 = arith.constant 9.99999974E-6 : f32
    %19 = vector.broadcast %cst_9 : f32 to vector<128x1xf32>
    %20 = arith.addf %16, %19 : vector<128x1xf32>
    %21 = math.rsqrt %20 : vector<128x1xf32>
    %22 = vector.broadcast %21 : vector<128x1xf32> to vector<128x160xf32>
    %23 = arith.mulf %18, %22 : vector<128x160xf32>
    %c0_10 = arith.constant 0 : index
    %c0_11 = arith.constant 0 : index
    %24 = vector.load %arg4[%c0_10, %c0_11] : memref<1x160xf32, #tpu.memory_space<vmem>>, vector<1x160xf32>
    %25 = vector.broadcast %24 : vector<1x160xf32> to vector<128x160xf32>
    %26 = arith.mulf %23, %25 : vector<128x160xf32>
    %c0_12 = arith.constant 0 : index
    %c0_13 = arith.constant 0 : index
    %27 = vector.load %arg5[%c0_12, %c0_13] : memref<1x160xf32, #tpu.memory_space<vmem>>, vector<1x160xf32>
    %28 = vector.broadcast %27 : vector<1x160xf32> to vector<128x160xf32>
    %29 = arith.addf %26, %28 : vector<128x160xf32>
    %cst_14 = arith.constant 0.000000e+00 : f32
    %30 = vector.broadcast %cst_14 : f32 to vector<128x160xf32>
    %31 = arith.maximumf %29, %30 : vector<128x160xf32>
    %c0_15 = arith.constant 0 : index
    %c0_16 = arith.constant 0 : index
    %32 = vector.load %arg6[%c0_15, %c0_16] : memref<2x160xf32, #tpu.memory_space<vmem>>, vector<2x160xf32>
    %cst_17 = arith.constant dense<0.000000e+00> : vector<2x128xf32>
    %33 = tpu.matmul %32, %31, %cst_17 {dimension_numbers = #tpu.dot_dimension_numbers<[1], [1], [0], [0], [0, 0, 1, 0], [], []>} : vector<2x160xf32>, vector<128x160xf32>, vector<2x128xf32> -> vector<2x128xf32>
    %c0_18 = arith.constant 0 : index
    %c0_19 = arith.constant 0 : index
    %34 = vector.load %arg7[%c0_18, %c0_19] : memref<2x1xf32, #tpu.memory_space<vmem>>, vector<2x1xf32>
    %35 = vector.broadcast %34 : vector<2x1xf32> to vector<2x128xf32>
    %36 = arith.addf %33, %35 : vector<2x128xf32>
    %c0_20 = arith.constant 0 : index
    %c0_21 = arith.constant 0 : index
    %37 = vector.load %arg8[%c0_20, %c0_21] : memref<2x128xf32, #tpu.memory_space<vmem>>, vector<2x128xf32>
    tpu.vector_store %arg8[%c0_20, %c0_21], %36 {strides = array<i32>} : memref<2x128xf32, #tpu.memory_space<vmem>>, vector<2x128xf32>,
    return
  }
  func.func @transform_0(%arg0: i32) -> (i32, i32) {
    %c0_i32 = arith.constant 0 : i32
    %c0_i32_0 = arith.constant 0 : i32
    return %arg0, %c0_i32 : i32, i32
  }
  func.func @transform_1(%arg0: i32) -> (i32, i32) {
    %c0_i32 = arith.constant 0 : i32
    %c0_i32_0 = arith.constant 0 : i32
    %c0_i32_1 = arith.constant 0 : i32
    return %c0_i32, %c0_i32_0 : i32, i32
  }
  func.func @transform_2(%arg0: i32) -> (i32, i32) {
    %c0_i32 = arith.constant 0 : i32
    %c0_i32_0 = arith.constant 0 : i32
    %c0_i32_1 = arith.constant 0 : i32
    return %c0_i32, %c0_i32_0 : i32, i32
  }
  func.func @transform_3(%arg0: i32) -> (i32, i32) {
    %c0_i32 = arith.constant 0 : i32
    %c0_i32_0 = arith.constant 0 : i32
    %c0_i32_1 = arith.constant 0 : i32
    return %c0_i32, %c0_i32_0 : i32, i32
  }
  func.func @transform_4(%arg0: i32) -> (i32, i32) {
    %c0_i32 = arith.constant 0 : i32
    %c0_i32_0 = arith.constant 0 : i32
    %c0_i32_1 = arith.constant 0 : i32
    return %c0_i32, %c0_i32_0 : i32, i32
  }
  func.func @transform_5(%arg0: i32) -> (i32, i32) {
    %c0_i32 = arith.constant 0 : i32
    %c0_i32_0 = arith.constant 0 : i32
    %c0_i32_1 = arith.constant 0 : i32
    return %c0_i32, %c0_i32_0 : i32, i32
  }
  func.func @transform_6(%arg0: i32) -> (i32, i32) {
    %c0_i32 = arith.constant 0 : i32
    %c0_i32_0 = arith.constant 0 : i32
    %c0_i32_1 = arith.constant 0 : i32
    return %c0_i32, %c0_i32_0 : i32, i32
  }
  func.func @transform_7(%arg0: i32) -> (i32, i32) {
    %c0_i32 = arith.constant 0 : i32
    %c0_i32_0 = arith.constant 0 : i32
    return %c0_i32, %arg0 : i32, i32
  }
}

</mosaic_0001>

<bundles_post_ra>
// kernel: tpu_custom_call.1
= control target key start
LH: loop header
LB: loop body
LE: loop exit
PB: predicated region body
PF: predicated region fallthrough
CT: control target
= control target key end

     0   :  { %v954_v2 = vmov 0   ;;  %vm108_vm0 = vcmask 130048   ;;  %s1527_s0 = inlined_call_operand.vmem [shape: bf16[128,16], index: 0, kind: input, shape index: {}]   ;;  %s1528_s1 = inlined_call_operand.vmem [shape: bf16[16,160], index: 1, kind: input, shape index: {}]   ;;  %s1529_s2 = inlined_call_operand.vmem [shape: f32[1,160], index: 2, kind: input, shape index: {}]   ;;  %s1530_s3 = inlined_call_operand.vmem [shape: f32[1,160], index: 3, kind: input, shape index: {}]   ;;  %s1531_s4 = inlined_call_operand.vmem [shape: f32[1,160], index: 4, kind: input, shape index: {}]   ;;  %s1532_s5 = inlined_call_operand.vmem [shape: f32[2,160], index: 5, kind: input, shape index: {}]   ;;  %s1533_s6 = inlined_call_operand.vmem [shape: f32[2,1], index: 6, kind: input, shape index: {}]   ;;  %s1534_s7 = inlined_call_operand.hbm [shape: f32[2,128], index: 7, kind: output, shape index: {}]  }
   0x1   :  { %v887_v0 = vld [vmem:[%s1528_s1 + $0x4] ss:$8 sps:$4 sm:$0xff]   ;;  %v889_v1 = vld [vmem:[%s1528_s1] ss:$8 sps:$4 sm:$0xff]   ;;  %165 = vmatprep.mubr.bf16.mxu0 %v954_v2  ;;  %886 = vset.pattern.permute.xlu0 %v954_v2 }
   0x2   :  { %133 = vmatprep.subr.bf16.mxu0 %v887_v0  ;;  %v890_v3 = vld [vmem:[%s1527_s0] sm:$0xff]  }
   0x3   :  { %134 = vmatpush1.bf16.msra.mxu0 %v889_v1 }
   0x6   :  { %818 = vmatmul.mubr.msk.bf16.vlgmr.msra.gmra.mrb[0].mxu0 %vm108_vm0, %v890_v3 }
   0x7   :  { %175 = vmatprep.mubr.bf16.mxu0 %v954_v2 }
   0x8   :  { %12 = vsyncpa [#allocation3], 0  ;;  %v891_v4 = vld [vmem:[%s1527_s0 + $0x8] sm:$0xff]   ;;  %v892_v5 = vld [vmem:[%s1527_s0 + $0x10] sm:$0xff]   ;;  %v48_v11 = vlaneseq  ;;  %vm246_vm1 = vcmask 261120  }
   0x9   :  { %v893_v6 = vld [vmem:[%s1527_s0 + $0x18] sm:$0xff]   ;;  %v894_v7 = vld [vmem:[%s1527_s0 + $0x20] sm:$0xff]   ;;  %v895_v8 = vld [vmem:[%s1527_s0 + $0x28] sm:$0xff]  }
   0xa   :  { %v896_v9 = vld [vmem:[%s1527_s0 + $0x30] sm:$0xff]   ;;  %v897_v10 = vld [vmem:[%s1527_s0 + $0x38] sm:$0xff]   ;;  %v49_v12 = vshrl.u32 %v48_v11, 7  ;;  %v46_v14 = vld [vmem:[%s1529_s2] sm:$0x3] }
   0xb   :  { %vm1414_vm2 = vmpackc.low %vm246_vm1, %vm246_vm1 }
   0xc   :  { %v1034_v13 = vsub.s32 1, %v49_v12  ;;  %v1039_v15 = vsub.s32 0, %v49_v12 }
   0xe   :  { %819 = vmatmul.mubr.msk.bf16.gmra.mrb[4].mxu0 %vm108_vm0, %v891_v4  ;;  %v1042_v16 = vrot.slane %v46_v14, %v1034_v13  ;;  %v1045_v17 = vrot.slane %v46_v14, %v1039_v15 }
   0xf   :  { %185 = vmatprep.mubr.bf16.mxu0 %v954_v2 }
  0x16   :  { %820 = vmatmul.mubr.msk.bf16.gmra.mrb[8].mxu0 %vm108_vm0, %v892_v5 }
  0x17   :  { %195 = vmatprep.mubr.bf16.mxu0 %v954_v2 }
  0x1e   :  { %821 = vmatmul.mubr.msk.bf16.gmra.mrb[12].mxu0 %vm108_vm0, %v893_v6 }
  0x1f   :  { %205 = vmatprep.mubr.bf16.mxu0 %v954_v2 }
  0x26   :  { %822 = vmatmul.mubr.msk.bf16.gmra.mrb[16].mxu0 %vm108_vm0, %v894_v7 }
  0x27   :  { %215 = vmatprep.mubr.bf16.mxu0 %v954_v2 }
  0x2e   :  { %823 = vmatmul.mubr.msk.bf16.gmra.mrb[20].mxu0 %vm108_vm0, %v895_v8 }
  0x2f   :  { %225 = vmatprep.mubr.bf16.mxu0 %v954_v2 }
  0x36   :  { %824 = vmatmul.mubr.msk.bf16.gmra.mrb[24].mxu0 %vm108_vm0, %v896_v9 }
  0x37   :  { %235 = vmatprep.mubr.bf16.mxu0 %v954_v2 }
  0x3e   :  { %825 = vmatmul.mubr.msk.bf16.gmra.mrb[28].mxu0 %vm108_vm0, %v897_v10 }
  0xd9   :  { %v167_v18 = vpop.f32.mrb[0].mxu0 }
  0xda   :  { %v169_v19 = vpop.f32.mrb[1].mxu0  ;;  %v1051_v22 = vadd.f32 %v167_v18, %v1045_v17 }
  0xdb   :  { %v1048_v20 = vadd.f32 %v169_v19, %v1042_v16  ;;  %v171_v21 = vpop.f32.mrb[2].mxu0 }
  0xdc   :  { %v173_v23 = vpop.f32.mrb[3].mxu0  ;;  %v1062_v28 = vadd.f32 %v171_v21, %v1045_v17 }
  0xdd   :  { %v1054_v24 = vadd.f32 %v173_v23, %v1042_v16  ;;  %v247_v25 = vsel %vm246_vm1, %v1048_v20, 0.0 }
  0xde   :  { %v248_v26 = vadd.f32 %v247_v25, %v1051_v22 }
  0xdf   :  { %v251_v27 = vsel %vm246_vm1, %v1054_v24, 0.0 }
  0xe0   :  { %249 = vadd.xlane.f32.xlu0 %v248_v26  ;;  %v252_v31 = vadd.f32 %v251_v27, %v1062_v28 }
  0xe1   :  { %v177_v29 = vpop.f32.mrb[4].mxu0 }
  0xe2   :  { %v179_v30 = vpop.f32.mrb[5].mxu0  ;;  %v1069_v34 = vadd.f32 %v177_v29, %v1045_v17 }
  0xe3   :  { %v1066_v32 = vadd.f32 %v179_v30, %v1042_v16  ;;  %v181_v33 = vpop.f32.mrb[6].mxu0 }
  0xe4   :  { %v183_v35 = vpop.f32.mrb[7].mxu0  ;;  %253 = vadd.xlane.f32.xlu0 %v252_v31  ;;  %v1080_v40 = vadd.f32 %v181_v33, %v1045_v17 }
  0xe5   :  { %v1072_v36 = vadd.f32 %v183_v35, %v1042_v16  ;;  %v255_v37 = vsel %vm246_vm1, %v1066_v32, 0.0 }
  0xe6   :  { %v256_v38 = vadd.f32 %v255_v37, %v1069_v34 }
  0xe7   :  { %v259_v39 = vsel %vm246_vm1, %v1072_v36, 0.0 }
  0xe8   :  { %257 = vadd.xlane.f32.xlu1 %v256_v38  ;;  %v260_v44 = vadd.f32 %v259_v39, %v1080_v40 }
  0xe9   :  { %v187_v41 = vpop.f32.mrb[8].mxu0 }
  0xea   :  { %v1083_v42 = vadd.f32 %v187_v41, %v1045_v17  ;;  %v189_v43 = vpop.f32.mrb[9].mxu0 }
  0xeb   :  { %v1087_v45 = vadd.f32 %v189_v43, %v1042_v16  ;;  %v191_v46 = vpop.f32.mrb[10].mxu0 }
  0xec   :  { %v193_v47 = vpop.f32.mrb[11].mxu0  ;;  %261 = vadd.xlane.f32.xlu1 %v260_v44  ;;  %v1095_v50 = vadd.f32 %v191_v46, %v1045_v17 }
  0xed   :  { %v1090_v48 = vadd.f32 %v193_v47, %v1042_v16  ;;  %v263_v49 = vsel %vm246_vm1, %v1087_v45, 0.0 }
  0xee   :  { %v264_v51 = vadd.f32 %v263_v49, %v1083_v42 }
  0xef   :  { %v267_v52 = vsel %vm246_vm1, %v1090_v48, 0.0 }
  0xf0   :  { %265 = vadd.xlane.f32.xlu0 %v264_v51  ;;  %v268_v53 = vadd.f32 %v267_v52, %v1095_v50 }
  0xf1   :  { %v197_v54 = vpop.f32.mrb[12].mxu0 }
  0xf2   :  { %v1102_v55 = vadd.f32 %v197_v54, %v1045_v17  ;;  %v199_v56 = vpop.f32.mrb[13].mxu0  ;;  %269 = vadd.xlane.f32.xlu1 %v268_v53 }
  0xf3   :  { %v1105_v57 = vadd.f32 %v199_v56, %v1042_v16  ;;  %v201_v58 = vpop.f32.mrb[14].mxu0 }
  0xf4   :  { %v203_v59 = vpop.f32.mrb[15].mxu0  ;;  %v1113_v62 = vadd.f32 %v201_v58, %v1045_v17 }
  0xf5   :  { %v1108_v60 = vadd.f32 %v203_v59, %v1042_v16  ;;  %v271_v61 = vsel %vm246_vm1, %v1105_v57, 0.0 }
  0xf6   :  { %v272_v63 = vadd.f32 %v271_v61, %v1102_v55 }
  0xf7   :  { %v275_v0 = vsel %vm246_vm1, %v1108_v60, 0.0 }
  0xf8   :  { %273 = vadd.xlane.f32.xlu0 %v272_v63  ;;  %v276_v1 = vadd.f32 %v275_v0, %v1113_v62 }
  0xf9   :  { %v207_v2 = vpop.f32.mrb[16].mxu0 }
  0xfa   :  { %v1120_v3 = vadd.f32 %v207_v2, %v1045_v17  ;;  %v209_v4 = vpop.f32.mrb[17].mxu0  ;;  %277 = vadd.xlane.f32.xlu1 %v276_v1 }
  0xfb   :  { %v1123_v5 = vadd.f32 %v209_v4, %v1042_v16  ;;  %v211_v6 = vpop.f32.mrb[18].mxu0 }
  0xfc   :  { %v213_v7 = vpop.f32.mrb[19].mxu0  ;;  %v1131_v10 = vadd.f32 %v211_v6, %v1045_v17 }
  0xfd   :  { %v1126_v8 = vadd.f32 %v213_v7, %v1042_v16  ;;  %v279_v9 = vsel %vm246_vm1, %v1123_v5, 0.0 }
  0xfe   :  { %v280_v11 = vadd.f32 %v279_v9, %v1120_v3 }
  0xff   :  { %v283_v12 = vsel %vm246_vm1, %v1126_v8, 0.0 }
 0x100   :  { %281 = vadd.xlane.f32.xlu0 %v280_v11  ;;  %v284_v14 = vadd.f32 %v283_v12, %v1131_v10 }
 0x101   :  { %v217_v18 = vpop.f32.mrb[20].mxu0 }
 0x102   :  { %v1138_v19 = vadd.f32 %v217_v18, %v1045_v17  ;;  %v219_v21 = vpop.f32.mrb[21].mxu0  ;;  %285 = vadd.xlane.f32.xlu1 %v284_v14 }
 0x103   :  { %v1141_v23 = vadd.f32 %v219_v21, %v1042_v16  ;;  %v221_v25 = vpop.f32.mrb[22].mxu0 }
 0x104   :  { %v223_v26 = vpop.f32.mrb[23].mxu0  ;;  %v1149_v30 = vadd.f32 %v221_v25, %v1045_v17 }
 0x105   :  { %v1144_v27 = vadd.f32 %v223_v26, %v1042_v16  ;;  %v287_v29 = vsel %vm246_vm1, %v1141_v23, 0.0 }
 0x106   :  { %v288_v31 = vadd.f32 %v287_v29, %v1138_v19 }
 0x107   :  { %v291_v33 = vsel %vm246_vm1, %v1144_v27, 0.0 }
 0x108   :  { %289 = vadd.xlane.f32.xlu0 %v288_v31  ;;  %v292_v35 = vadd.f32 %v291_v33, %v1149_v30 }
 0x109   :  { %v227_v37 = vpop.f32.mrb[24].mxu0 }
 0x10a   :  { %v1156_v38 = vadd.f32 %v227_v37, %v1045_v17  ;;  %v229_v39 = vpop.f32.mrb[25].mxu0  ;;  %293 = vadd.xlane.f32.xlu1 %v292_v35 }
 0x10b   :  { %v1159_v41 = vadd.f32 %v229_v39, %v1042_v16  ;;  %v231_v43 = vpop.f32.mrb[26].mxu0 }
 0x10c   :  { %v233_v44 = vpop.f32.mrb[27].mxu0  ;;  %v1167_v49 = vadd.f32 %v231_v43, %v1045_v17 }
 0x10d   :  { %v1162_v46 = vadd.f32 %v233_v44, %v1042_v16  ;;  %v295_v47 = vsel %vm246_vm1, %v1159_v41, 0.0 }
 0x10e   :  { %v296_v51 = vadd.f32 %v295_v47, %v1156_v38 }
 0x10f   :  { %v299_v52 = vsel %vm246_vm1, %v1162_v46, 0.0 }
 0x110   :  { %297 = vadd.xlane.f32.xlu0 %v296_v51  ;;  %v300_v53 = vadd.f32 %v299_v52, %v1167_v49 }
 0x111   :  { %v237_v54 = vpop.f32.mrb[28].mxu0 }
 0x112   :  { %v1174_v56 = vadd.f32 %v237_v54, %v1045_v17  ;;  %v239_v58 = vpop.f32.mrb[29].mxu0  ;;  %301 = vadd.xlane.f32.xlu1 %v300_v53 }
 0x113   :  { %v1177_v59 = vadd.f32 %v239_v58, %v1042_v16  ;;  %v241_v61 = vpop.f32.mrb[30].mxu0 }
 0x114   :  { %v243_v63 = vpop.f32.mrb[31].mxu0  ;;  %v1185_v2 = vadd.f32 %v241_v61, %v1045_v17 }
 0x115   :  { %v1180_v0 = vadd.f32 %v243_v63, %v1042_v16  ;;  %v303_v1 = vsel %vm246_vm1, %v1177_v59, 0.0 }
 0x116   :  { %v304_v4 = vadd.f32 %v303_v1, %v1174_v56 }
 0x117   :  { %v307_v6 = vsel %vm246_vm1, %v1180_v0, 0.0 }
 0x118   :  { %305 = vadd.xlane.f32.xlu0 %v304_v4  ;;  %v308_v7 = vadd.f32 %v307_v6, %v1185_v2 }
 0x11a   :  { %309 = vadd.xlane.f32.xlu1 %v308_v7 }
 0x16d   :  { %v250_v9 = vpop.xlane.xlu0 %249 }
 0x16e   :  { %v312_v11 = vmul.f32 0.00625, %v250_v9 }
 0x170   :  { %v1192_v16 = vsub.f32 %v1051_v22, %v312_v11  ;;  %v1195_v12 = vsub.f32 %v1048_v20, %v312_v11 }
 0x171   :  { %v254_v14 = vpop.xlane.xlu0 %253 }
 0x172   :  { %v313_v17 = vmul.f32 0.00625, %v254_v14  ;;  %v360_v18 = vmul.f32 %v1192_v16, %v1192_v16  ;;  %v361_v21 = vmul.f32 %v1195_v12, %v1195_v12 }
 0x174   :  { %v1202_v25 = vsub.f32 %v1062_v28, %v313_v17  ;;  %v1205_v26 = vsub.f32 %v1054_v24, %v313_v17  ;;  %v392_v22 = vsel %vm246_vm1, %v361_v21, 0.0 }
 0x175   :  { %v258_v29 = vpop.xlane.xlu1 %257  ;;  %v393_v31 = vadd.f32 %v392_v22, %v360_v18 }
 0x176   :  { %v314_v20 = vmul.f32 0.00625, %v258_v29  ;;  %v362_v33 = vmul.f32 %v1202_v25, %v1202_v25  ;;  %v363_v35 = vmul.f32 %v1205_v26, %v1205_v26 }
 0x177   :  { %394 = vadd.xlane.f32.xlu0 %v393_v31 }
 0x178   :  { %v1213_v37 = vsub.f32 %v1069_v34, %v314_v20  ;;  %v1216_v28 = vsub.f32 %v1066_v32, %v314_v20  ;;  %v396_v24 = vsel %vm246_vm1, %v363_v35, 0.0 }
 0x179   :  { %v262_v39 = vpop.xlane.xlu1 %261  ;;  %v397_v43 = vadd.f32 %v396_v24, %v362_v33 }
 0x17a   :  { %v315_v44 = vmul.f32 0.00625, %v262_v39  ;;  %v364_v47 = vmul.f32 %v1213_v37, %v1213_v37  ;;  %v365_v51 = vmul.f32 %v1216_v28, %v1216_v28 }
 0x17b   :  { %398 = vadd.xlane.f32.xlu1 %v397_v43 }
 0x17c   :  { %v1224_v52 = vsub.f32 %v1080_v40, %v315_v44  ;;  %v1227_v34 = vsub.f32 %v1072_v36, %v315_v44  ;;  %v400_v32 = vsel %vm246_vm1, %v365_v51, 0.0 }
 0x17d   :  { %v266_v53 = vpop.xlane.xlu0 %265  ;;  %v401_v54 = vadd.f32 %v400_v32, %v364_v47 }
 0x17e   :  { %v316_v58 = vmul.f32 0.00625, %v266_v53  ;;  %v366_v61 = vmul.f32 %v1224_v52, %v1224_v52  ;;  %v367_v63 = vmul.f32 %v1227_v34, %v1227_v34 }
 0x17f   :  { %v270_v1 = vpop.xlane.xlu1 %269  ;;  %402 = vadd.xlane.f32.xlu0 %v401_v54 }
 0x180   :  { %v1235_v4 = vsub.f32 %v1083_v42, %v316_v58  ;;  %v1238_v40 = vsub.f32 %v1087_v45, %v316_v58  ;;  %v317_v36 = vmul.f32 0.00625, %v270_v1  ;;  %v404_v6 = vsel %vm246_vm1, %v367_v63, 0.0 }
 0x181   :  { %v405_v7 = vadd.f32 %v404_v6, %v366_v61 }
 0x182   :  { %v1242_v9 = vsub.f32 %v1095_v50, %v317_v36  ;;  %v1245_v11 = vsub.f32 %v1090_v48, %v317_v36  ;;  %v368_v14 = vmul.f32 %v1235_v4, %v1235_v4  ;;  %v369_v42 = vmul.f32 %v1238_v40, %v1238_v40 }
 0x183   :  { %406 = vadd.xlane.f32.xlu1 %v405_v7 }
 0x184   :  { %v408_v45 = vsel %vm246_vm1, %v369_v42, 0.0  ;;  %v370_v17 = vmul.f32 %v1242_v9, %v1242_v9  ;;  %v371_v18 = vmul.f32 %v1245_v11, %v1245_v11 }
 0x185   :  { %v274_v50 = vpop.xlane.xlu0 %273  ;;  %v409_v21 = vadd.f32 %v408_v45, %v368_v14 }
 0x186   :  { %v318_v22 = vmul.f32 0.00625, %v274_v50  ;;  %v412_v48 = vsel %vm246_vm1, %v371_v18, 0.0 }
 0x187   :  { %v278_v29 = vpop.xlane.xlu1 %277  ;;  %410 = vadd.xlane.f32.xlu0 %v409_v21  ;;  %v413_v31 = vadd.f32 %v412_v48, %v370_v17 }
 0x188   :  { %v1258_v20 = vsub.f32 %v1102_v55, %v318_v22  ;;  %v1261_v33 = vsub.f32 %v1105_v57, %v318_v22  ;;  %v319_v35 = vmul.f32 0.00625, %v278_v29 }
 0x189   :  { %414 = vadd.xlane.f32.xlu1 %v413_v31 }
 0x18a   :  { %v1264_v24 = vsub.f32 %v1113_v62, %v319_v35  ;;  %v1267_v39 = vsub.f32 %v1108_v60, %v319_v35  ;;  %v372_v43 = vmul.f32 %v1258_v20, %v1258_v20  ;;  %v373_v44 = vmul.f32 %v1261_v33, %v1261_v33 }
 0x18c   :  { %v416_v55 = vsel %vm246_vm1, %v373_v44, 0.0  ;;  %v374_v57 = vmul.f32 %v1264_v24, %v1264_v24  ;;  %v375_v47 = vmul.f32 %v1267_v39, %v1267_v39 }
 0x18d   :  { %v282_v51 = vpop.xlane.xlu0 %281  ;;  %v417_v62 = vadd.f32 %v416_v55, %v372_v43 }
 0x18e   :  { %v320_v32 = vmul.f32 0.00625, %v282_v51  ;;  %v420_v60 = vsel %vm246_vm1, %v375_v47, 0.0 }
 0x18f   :  { %v286_v53 = vpop.xlane.xlu1 %285  ;;  %418 = vadd.xlane.f32.xlu0 %v417_v62  ;;  %v421_v54 = vadd.f32 %v420_v60, %v374_v57 }
 0x190   :  { %v1280_v58 = vsub.f32 %v1120_v3, %v320_v32  ;;  %v1283_v61 = vsub.f32 %v1123_v5, %v320_v32  ;;  %v321_v63 = vmul.f32 0.00625, %v286_v53 }
 0x191   :  { %422 = vadd.xlane.f32.xlu1 %v421_v54 }
 0x192   :  { %v1286_v1 = vsub.f32 %v1131_v10, %v321_v63  ;;  %v1289_v36 = vsub.f32 %v1126_v8, %v321_v63  ;;  %v376_v6 = vmul.f32 %v1280_v58, %v1280_v58  ;;  %v377_v7 = vmul.f32 %v1283_v61, %v1283_v61 }
 0x194   :  { %v424_v3 = vsel %vm246_vm1, %v377_v7, 0.0  ;;  %v378_v5 = vmul.f32 %v1286_v1, %v1286_v1  ;;  %v379_v14 = vmul.f32 %v1289_v36, %v1289_v36 }
 0x195   :  { %v290_v42 = vpop.xlane.xlu0 %289  ;;  %v425_v10 = vadd.f32 %v424_v3, %v376_v6 }
 0x196   :  { %v322_v45 = vmul.f32 0.00625, %v290_v42  ;;  %v428_v8 = vsel %vm246_vm1, %v379_v14, 0.0 }
 0x197   :  { %v294_v17 = vpop.xlane.xlu1 %293  ;;  %426 = vadd.xlane.f32.xlu0 %v425_v10  ;;  %v429_v18 = vadd.f32 %v428_v8, %v378_v5 }
 0x198   :  { %v1302_v50 = vsub.f32 %v1138_v19, %v322_v45  ;;  %v1305_v21 = vsub.f32 %v1141_v23, %v322_v45  ;;  %v323_v22 = vmul.f32 0.00625, %v294_v17 }
 0x199   :  { %430 = vadd.xlane.f32.xlu1 %v429_v18 }
 0x19a   :  { %v1308_v48 = vsub.f32 %v1149_v30, %v323_v22  ;;  %v1311_v29 = vsub.f32 %v1144_v27, %v323_v22  ;;  %v380_v31 = vmul.f32 %v1302_v50, %v1302_v50  ;;  %v381_v35 = vmul.f32 %v1305_v21, %v1305_v21 }
 0x19c   :  { %v432_v19 = vsel %vm246_vm1, %v381_v35, 0.0  ;;  %v382_v23 = vmul.f32 %v1308_v48, %v1308_v48  ;;  %v383_v43 = vmul.f32 %v1311_v29, %v1311_v29 }
 0x19d   :  { %v298_v44 = vpop.xlane.xlu0 %297  ;;  %v433_v30 = vadd.f32 %v432_v19, %v380_v31  ;;  %v1370_v19 = vld.sshfl [vmem:[%s1532_s5] sm:$0x33 pattern:$0x76325410] }
 0x19e   :  { %v324_v55 = vmul.f32 0.00625, %v298_v44  ;;  %v436_v27 = vsel %vm246_vm1, %v383_v43, 0.0  ;;  %v657_v43 = vld [vmem:[%s1533_s6] sm:$0x3] }
 0x19f   :  { %v302_v57 = vpop.xlane.xlu1 %301  ;;  %434 = vadd.xlane.f32.xlu0 %v433_v30  ;;  %v437_v47 = vadd.f32 %v436_v27, %v382_v23  ;;  %v671_v23 = vcombine.high %v1370_v19, %v1370_v19 }
 0x1a0   :  { %v1324_v51 = vsub.f32 %v1156_v38, %v324_v55  ;;  %v1327_v62 = vsub.f32 %v1159_v41, %v324_v55  ;;  %v325_v32 = vmul.f32 0.00625, %v302_v57 }
 0x1a1   :  { %438 = vadd.xlane.f32.xlu1 %v437_v47  ;;  %843 = vmatprep.mubr.msk.f32.mxu1 %vm246_vm1, %v671_v23 }
 0x1a2   :  { %v1330_v60 = vsub.f32 %v1167_v49, %v325_v32  ;;  %v1333_v53 = vsub.f32 %v1162_v46, %v325_v32  ;;  %v384_v54 = vmul.f32 %v1324_v51, %v1324_v51  ;;  %v385_v63 = vmul.f32 %v1327_v62, %v1327_v62 }
 0x1a4   :  { %v440_v38 = vsel %vm246_vm1, %v385_v63, 0.0  ;;  %v386_v41 = vmul.f32 %v1330_v60, %v1330_v60  ;;  %v387_v6 = vmul.f32 %v1333_v53, %v1333_v53 }
 0x1a5   :  { %v306_v7 = vpop.xlane.xlu0 %305  ;;  %v441_v49 = vadd.f32 %v440_v38, %v384_v54  ;;  %v536_v38 = vld [vmem:[%s1530_s3] sm:$0x3]  ;;  %s955_s3 = smov [#allocation2]  }
 0x1a6   :  { %v326_v3 = vmul.f32 0.00625, %v306_v7  ;;  %v444_v46 = vsel %vm246_vm1, %v387_v6, 0.0  ;;  %v1382_v7 = vrot.slane %v536_v38, %v1034_v13 }
 0x1a7   :  { %v310_v5 = vpop.xlane.xlu1 %309  ;;  %442 = vadd.xlane.f32.xlu0 %v441_v49  ;;  %v445_v14 = vadd.f32 %v444_v46, %v386_v41  ;;  %v580_v49 = vld [vmem:[%s1531_s4] sm:$0x3]  ;;  %s800_s4 = sshll.u32 %s955_s3, 4  ;;  %s801_s4 = int_to_ptr.vmem [resolvable:$true] %s800_s4 }
 0x1a8   :  { %v1346_v42 = vsub.f32 %v1174_v56, %v326_v3  ;;  %v1349_v10 = vsub.f32 %v1177_v59, %v326_v3  ;;  %v327_v45 = vmul.f32 0.00625, %v310_v5  ;;  %v1388_v3 = vrot.slane %v536_v38, %v1039_v15  ;;  %s930_s26 = scalar_lea.vmem %s801_s4, 32  ;;  %p935_p1 = scmp.lt.s32.totalorder %s801_s4, %s801_s4 }
 0x1a9   :  { %446 = vadd.xlane.f32.xlu1 %v445_v14  ;;  %p931_p0 = scmp.ne.s32.totalorder %s801_s4, %s930_s26  ;;  %p936_p2 = scmp.lt.s32.totalorder %s930_s26, %s930_s26 }
 0x1aa   :  { %v1352_v8 = vsub.f32 %v1185_v2, %v327_v45  ;;  %v1355_v17 = vsub.f32 %v1180_v0, %v327_v45  ;;  %v388_v18 = vmul.f32 %v1346_v42, %v1346_v42  ;;  %v389_v22 = vmul.f32 %v1349_v10, %v1349_v10 }
 0x1ab   :  { %p937_p3 = por %p936_p2, %p935_p1 }
 0x1ac   :  { %v448_v56 = vsel %vm246_vm1, %v389_v22, 0.0  ;;  %v390_v59 = vmul.f32 %v1352_v8, %v1352_v8  ;;  %v391_v31 = vmul.f32 %v1355_v17, %v1355_v17 }
 0x1ad   :  { %v449_v35 = vadd.f32 %v448_v56, %v388_v18  ;;  %v1393_v56 = vrot.slane %v580_v49, %v1034_v13  ;;  %p938_p4 = pnand %p937_p3, %p931_p0 }
 0x1ae   :  { %v452_v2 = vsel %vm246_vm1, %v391_v31, 0.0 }
 0x1af   :  { %450 = vadd.xlane.f32.xlu0 %v449_v35  ;;  %v453_v0 = vadd.f32 %v452_v2, %v390_v59  ;;  %v1396_v59 = vrot.slane %v580_v49, %v1039_v15 }
 0x1b1   :  { %454 = vadd.xlane.f32.xlu1 %v453_v0 }
 0x1c5   :  { %660 = vperm.xlu0 %886, %v657_v43  }
 0x204   :  { %v395_v44 = vpop.xlane.xlu0 %394 }
 0x205   :  { %v456_v30 = vmul.f32 0.00625, %v395_v44 }
 0x207   :  { %v472_v55 = vadd.f32 1e-05, %v456_v30 }
 0x208   :  { %v399_v27 = vpop.xlane.xlu1 %398 }
 0x209   :  { %898 = vrsqrt.f32 %v472_v55  ;;  %v457_v57 = vmul.f32 0.00625, %v399_v27 }
 0x20b   :  { %v473_v47 = vadd.f32 1e-05, %v457_v57 }
 0x20c   :  { %v403_v32 = vpop.xlane.xlu0 %402 }
 0x20d   :  { %900 = vrsqrt.f32 %v473_v47  ;;  %v458_v54 = vmul.f32 0.00625, %v403_v32 }
 0x20f   :  { %v474_v63 = vadd.f32 1e-05, %v458_v54 }
 0x210   :  { %v407_v41 = vpop.xlane.xlu1 %406 }
 0x211   :  { %902 = vrsqrt.f32 %v474_v63  ;;  %v459_v6 = vmul.f32 0.00625, %v407_v41 }
 0x213   :  { %v899_v46 = vpop.eup %898  ;;  %v475_v5 = vadd.f32 1e-05, %v459_v6 }
 0x214   :  { %v411_v14 = vpop.xlane.xlu0 %410  ;;  %v505_v45 = vmul.f32 %v899_v46, %v1195_v12  ;;  %v504_v18 = vmul.f32 %v899_v46, %v1192_v16 }
 0x215   :  { %904 = vrsqrt.f32 %v475_v5  ;;  %v460_v22 = vmul.f32 0.00625, %v411_v14 }
 0x216   :  { %v415_v31 = vpop.xlane.xlu1 %414  ;;  %v549_v35 = vmul.f32 %v1382_v7, %v505_v45  ;;  %v548_v2 = vmul.f32 %v1388_v3, %v504_v18 }
 0x217   :  { %v901_v0 = vpop.eup %900  ;;  %v476_v23 = vadd.f32 1e-05, %v460_v22  ;;  %v461_v43 = vmul.f32 0.00625, %v415_v31 }
 0x218   :  { %v507_v12 = vmul.f32 %v901_v0, %v1205_v26  ;;  %v506_v16 = vmul.f32 %v901_v0, %v1202_v25  ;;  %v593_v13 = vadd.f32 %v1393_v56, %v549_v35  ;;  %v592_v30 = vadd.f32 %v1396_v59, %v548_v2 }
 0x219   :  { %906 = vrsqrt.f32 %v476_v23  ;;  %v477_v44 = vadd.f32 1e-05, %v461_v43 }
 0x21a   :  { %v551_v15 = vmul.f32 %v1382_v7, %v507_v12  ;;  %v550_v55 = vmul.f32 %v1388_v3, %v506_v16  ;;  %v625_v63 = vmax.f32 %v593_v13, 0.0  ;;  %v624_v38 = vmax.f32 %v592_v30, 0.0 }
 0x21b   :  { %v903_v27 = vpop.eup %902  ;;  %908 = vrsqrt.f32 %v477_v44 }
 0x21c   :  { %v509_v57 = vmul.f32 %v903_v27, %v1216_v28  ;;  %v419_v47 = vpop.xlane.xlu0 %418  ;;  %v595_v32 = vadd.f32 %v1393_v56, %v551_v15  ;;  %v594_v26 = vadd.f32 %v1396_v59, %v550_v55  ;;  %v508_v25 = vmul.f32 %v903_v27, %v1213_v37 }
 0x21d   :  { %v462_v54 = vmul.f32 0.00625, %v419_v47 }
 0x21e   :  { %v423_v41 = vpop.xlane.xlu1 %422  ;;  %v627_v6 = vmax.f32 %v595_v32, 0.0  ;;  %v626_v49 = vmax.f32 %v594_v26, 0.0  ;;  %v553_v46 = vmul.f32 %v1382_v7, %v509_v57  ;;  %v552_v5 = vmul.f32 %v1388_v3, %v508_v25 }
 0x21f   :  { %v905_v14 = vpop.eup %904  ;;  %v478_v45 = vadd.f32 1e-05, %v462_v54  ;;  %v463_v28 = vmul.f32 0.00625, %v423_v41 }
 0x220   :  { %v511_v37 = vmul.f32 %v905_v14, %v1227_v34  ;;  %v844_v22 = vpack.c.bf16 %v627_v6, %v625_v63  ;;  %v847_v31 = vpack.c.bf16 %v626_v49, %v624_v38  ;;  %v597_v35 = vadd.f32 %v1393_v56, %v553_v46 }
 0x221   :  { %910 = vrsqrt.f32 %v478_v45  ;;  %v479_v2 = vadd.f32 1e-05, %v463_v28  ;;  %v510_v0 = vmul.f32 %v905_v14, %v1224_v52  ;;  %v596_v23 = vadd.f32 %v1396_v59, %v552_v5 }
 0x222   :  { %846 = vmatprep.subr.msk.bf16.mxu1 %vm1414_vm2, %v844_v22  ;;  %v555_v43 = vmul.f32 %v1382_v7, %v511_v37  ;;  %v629_v55 = vmax.f32 %v597_v35, 0.0 }
 0x223   :  { %v907_v12 = vpop.eup %906  ;;  %912 = vrsqrt.f32 %v479_v2  ;;  %848 = vmatpush1.bf16.xpose.msra.mxu1 %v847_v31  ;;  %v554_v34 = vmul.f32 %v1388_v3, %v510_v0  ;;  %v628_v57 = vmax.f32 %v596_v23, 0.0 }
 0x224   :  { %v513_v16 = vmul.f32 %v907_v12, %v1238_v40  ;;  %v427_v44 = vpop.xlane.xlu0 %426  ;;  %v599_v13 = vadd.f32 %v1393_v56, %v555_v43  ;;  %v512_v30 = vmul.f32 %v907_v12, %v1235_v4 }
 0x225   :  { %v909_v52 = vpop.eup %908  ;;  %v464_v15 = vmul.f32 0.00625, %v427_v44  ;;  %v598_v27 = vadd.f32 %v1396_v59, %v554_v34 }
 0x226   :  { %v515_v47 = vmul.f32 %v909_v52, %v1245_v11  ;;  %v431_v32 = vpop.xlane.xlu1 %430  ;;  %v631_v26 = vmax.f32 %v599_v13, 0.0  ;;  %v557_v25 = vmul.f32 %v1382_v7, %v513_v16  ;;  %v514_v54 = vmul.f32 %v909_v52, %v1242_v9 }
 0x227   :  { %v480_v40 = vadd.f32 1e-05, %v464_v15  ;;  %v465_v63 = vmul.f32 0.00625, %v431_v32  ;;  %v630_v38 = vmax.f32 %v598_v27, 0.0  ;;  %v556_v41 = vmul.f32 %v1388_v3, %v512_v30 }
 0x228   :  { %v849_v4 = vpack.c.bf16 %v631_v26, %v629_v55  ;;  %v559_v6 = vmul.f32 %v1382_v7, %v515_v47  ;;  %v601_v49 = vadd.f32 %v1393_v56, %v557_v25  ;;  %v558_v46 = vmul.f32 %v1388_v3, %v514_v54 }
 0x229   :  { %914 = vrsqrt.f32 %v480_v40  ;;  %v481_v11 = vadd.f32 1e-05, %v465_v63  ;;  %v852_v5 = vpack.c.bf16 %v630_v38, %v628_v57  ;;  %v600_v14 = vadd.f32 %v1396_v59, %v556_v41 }
 0x22a   :  { %851 = vmatprep.subr.msk.bf16.mxu1 %vm1414_vm2, %v849_v4  ;;  %v603_v9 = vadd.f32 %v1393_v56, %v559_v6  ;;  %v602_v45 = vadd.f32 %v1396_v59, %v558_v46  ;;  %v633_v31 = vmax.f32 %v601_v49, 0.0 }
 0x22b   :  { %v911_v28 = vpop.eup %910  ;;  %916 = vrsqrt.f32 %v481_v11  ;;  %853 = vmatpush1.bf16.xpose.msra.mxu1 %v852_v5  ;;  %v632_v44 = vmax.f32 %v600_v14, 0.0 }
 0x22c   :  { %v517_v37 = vmul.f32 %v911_v28, %v1261_v33  ;;  %v435_v22 = vpop.xlane.xlu0 %434  ;;  %v635_v35 = vmax.f32 %v603_v9, 0.0  ;;  %v516_v2 = vmul.f32 %v911_v28, %v1258_v20  ;;  %v634_v43 = vmax.f32 %v602_v45, 0.0 }
 0x22d   :  { %v913_v0 = vpop.eup %912  ;;  %v466_v23 = vmul.f32 0.00625, %v435_v22 }
 0x22e   :  { %v519_v12 = vmul.f32 %v913_v0, %v1267_v39  ;;  %v439_v34 = vpop.xlane.xlu1 %438  ;;  %v854_v16 = vpack.c.bf16 %v635_v35, %v633_v31  ;;  %v561_v13 = vmul.f32 %v1382_v7, %v517_v37  ;;  %v518_v15 = vmul.f32 %v913_v0, %v1264_v24 }
 0x22f   :  { %v482_v30 = vadd.f32 1e-05, %v466_v23  ;;  %v467_v52 = vmul.f32 0.00625, %v439_v34  ;;  %v560_v33 = vmul.f32 %v1388_v3, %v516_v2  ;;  %v857_v27 = vpack.c.bf16 %v634_v43, %v632_v44 }
 0x230   :  { %856 = vmatprep.subr.msk.bf16.mxu1 %vm1414_vm2, %v854_v16  ;;  %v563_v20 = vmul.f32 %v1382_v7, %v519_v12  ;;  %v605_v55 = vadd.f32 %v1393_v56, %v561_v13  ;;  %v562_v57 = vmul.f32 %v1388_v3, %v518_v15 }
 0x231   :  { %918 = vrsqrt.f32 %v482_v30  ;;  %v483_v39 = vadd.f32 1e-05, %v467_v52  ;;  %v604_v24 = vadd.f32 %v1396_v59, %v560_v33 }
 0x232   :  { %v607_v47 = vadd.f32 %v1393_v56, %v563_v20  ;;  %v606_v26 = vadd.f32 %v1396_v59, %v562_v57  ;;  %v637_v40 = vmax.f32 %v605_v55, 0.0 }
 0x233   :  { %v915_v32 = vpop.eup %914  ;;  %920 = vrsqrt.f32 %v483_v39  ;;  %858 = vmatpush1.bf16.xpose.msra.mxu1 %v857_v27  ;;  %v636_v28 = vmax.f32 %v604_v24, 0.0 }
 0x234   :  { %v521_v25 = vmul.f32 %v915_v32, %v1283_v61  ;;  %v443_v54 = vpop.xlane.xlu0 %442  ;;  %v639_v63 = vmax.f32 %v607_v47, 0.0  ;;  %v520_v38 = vmul.f32 %v915_v32, %v1280_v58  ;;  %v638_v6 = vmax.f32 %v606_v26, 0.0 }
 0x235   :  { %v917_v41 = vpop.eup %916  ;;  %v468_v4 = vmul.f32 0.00625, %v443_v54 }
 0x236   :  { %v523_v49 = vmul.f32 %v917_v41, %v1289_v36  ;;  %v447_v46 = vpop.xlane.xlu1 %446  ;;  %v859_v11 = vpack.c.bf16 %v639_v63, %v637_v40  ;;  %v565_v5 = vmul.f32 %v1382_v7, %v521_v25  ;;  %v522_v9 = vmul.f32 %v917_v41, %v1286_v1 }
 0x237   :  { %v484_v14 = vadd.f32 1e-05, %v468_v4  ;;  %v469_v45 = vmul.f32 0.00625, %v447_v46  ;;  %v564_v61 = vmul.f32 %v1388_v3, %v520_v38  ;;  %v862_v31 = vpack.c.bf16 %v638_v6, %v636_v28 }
 0x238   :  { %861 = vmatprep.subr.msk.bf16.mxu1 %vm1414_vm2, %v859_v11  ;;  %v567_v58 = vmul.f32 %v1382_v7, %v523_v49  ;;  %v609_v37 = vadd.f32 %v1393_v56, %v565_v5  ;;  %v566_v36 = vmul.f32 %v1388_v3, %v522_v9 }
 0x239   :  { %922 = vrsqrt.f32 %v484_v14  ;;  %v485_v22 = vadd.f32 1e-05, %v469_v45  ;;  %v608_v1 = vadd.f32 %v1396_v59, %v564_v61 }
 0x23a   :  { %v611_v35 = vadd.f32 %v1393_v56, %v567_v58  ;;  %v610_v2 = vadd.f32 %v1396_v59, %v566_v36  ;;  %v641_v12 = vmax.f32 %v609_v37, 0.0 }
 0x23b   :  { %v919_v0 = vpop.eup %918  ;;  %924 = vrsqrt.f32 %v485_v22  ;;  %863 = vmatpush1.bf16.xpose.msra.mxu1 %v862_v31  ;;  %v640_v20 = vmax.f32 %v608_v1, 0.0 }
 0x23c   :  { %v525_v23 = vmul.f32 %v919_v0, %v1305_v21  ;;  %v451_v43 = vpop.xlane.xlu0 %450  ;;  %v643_v34 = vmax.f32 %v611_v35, 0.0  ;;  %v524_v16 = vmul.f32 %v919_v0, %v1302_v50  ;;  %v642_v30 = vmax.f32 %v610_v2, 0.0 }
 0x23d   :  { %v921_v44 = vpop.eup %920  ;;  %v470_v13 = vmul.f32 0.00625, %v451_v43 }
 0x23e   :  { %v527_v52 = vmul.f32 %v921_v44, %v1311_v29  ;;  %v455_v15 = vpop.xlane.xlu1 %454  ;;  %v864_v33 = vpack.c.bf16 %v643_v34, %v641_v12  ;;  %v569_v55 = vmul.f32 %v1382_v7, %v525_v23  ;;  %v526_v57 = vmul.f32 %v921_v44, %v1308_v48 }
 0x23f   :  { %v486_v39 = vadd.f32 1e-05, %v470_v13  ;;  %v471_v27 = vmul.f32 0.00625, %v455_v15  ;;  %v568_v21 = vmul.f32 %v1388_v3, %v524_v16  ;;  %v867_v32 = vpack.c.bf16 %v642_v30, %v640_v20 }
 0x240   :  { %866 = vmatprep.subr.msk.bf16.mxu1 %vm1414_vm2, %v864_v33  ;;  %v571_v50 = vmul.f32 %v1382_v7, %v527_v52  ;;  %v613_v47 = vadd.f32 %v1393_v56, %v569_v55  ;;  %v570_v24 = vmul.f32 %v1388_v3, %v526_v57 }
 0x241   :  { %926 = vrsqrt.f32 %v486_v39  ;;  %v487_v29 = vadd.f32 1e-05, %v471_v27  ;;  %v612_v48 = vadd.f32 %v1396_v59, %v568_v21 }
 0x242   :  { %v615_v26 = vadd.f32 %v1393_v56, %v571_v50  ;;  %v614_v54 = vadd.f32 %v1396_v59, %v570_v24  ;;  %v645_v63 = vmax.f32 %v613_v47, 0.0 }
 0x243   :  { %v923_v25 = vpop.eup %922  ;;  %928 = vrsqrt.f32 %v487_v29  ;;  %868 = vmatpush1.bf16.xpose.msra.mxu1 %v867_v32  ;;  %v644_v9 = vmax.f32 %v612_v48, 0.0 }
 0x244   :  { %v529_v40 = vmul.f32 %v923_v25, %v1327_v62  ;;  %v647_v38 = vmax.f32 %v615_v26, 0.0  ;;  %v528_v41 = vmul.f32 %v923_v25, %v1324_v51  ;;  %v646_v6 = vmax.f32 %v614_v54, 0.0 }
 0x245   :  { %v925_v4 = vpop.eup %924 }
 0x246   :  { %v531_v49 = vmul.f32 %v925_v4, %v1333_v53  ;;  %v869_v46 = vpack.c.bf16 %v647_v38, %v645_v63  ;;  %v573_v11 = vmul.f32 %v1382_v7, %v529_v40  ;;  %v530_v5 = vmul.f32 %v925_v4, %v1330_v60 }
 0x247   :  { %v572_v14 = vmul.f32 %v1388_v3, %v528_v41  ;;  %v872_v28 = vpack.c.bf16 %v646_v6, %v644_v9 }
 0x248   :  { %871 = vmatprep.subr.msk.bf16.mxu1 %vm1414_vm2, %v869_v46  ;;  %v575_v62 = vmul.f32 %v1382_v7, %v531_v49  ;;  %v617_v45 = vadd.f32 %v1393_v56, %v573_v11  ;;  %v574_v51 = vmul.f32 %v1388_v3, %v530_v5 }
 0x249   :  { %v616_v60 = vadd.f32 %v1396_v59, %v572_v14 }
 0x24a   :  { %v619_v53 = vadd.f32 %v1393_v56, %v575_v62  ;;  %v618_v61 = vadd.f32 %v1396_v59, %v574_v51  ;;  %v649_v36 = vmax.f32 %v617_v45, 0.0 }
 0x24b   :  { %v927_v58 = vpop.eup %926  ;;  %873 = vmatpush1.bf16.xpose.msra.mxu1 %v872_v28  ;;  %v648_v43 = vmax.f32 %v616_v60, 0.0 }
 0x24c   :  { %v533_v37 = vmul.f32 %v927_v58, %v1349_v10  ;;  %v651_v22 = vmax.f32 %v619_v53, 0.0  ;;  %v532_v31 = vmul.f32 %v927_v58, %v1346_v42  ;;  %v650_v1 = vmax.f32 %v618_v61, 0.0 }
 0x24d   :  { %v929_v35 = vpop.eup %928 }
 0x24e   :  { %v535_v2 = vmul.f32 %v929_v35, %v1355_v17  ;;  %v874_v0 = vpack.c.bf16 %v651_v22, %v649_v36  ;;  %v577_v23 = vmul.f32 %v1382_v7, %v533_v37  ;;  %v534_v12 = vmul.f32 %v929_v35, %v1352_v8 }
 0x24f   :  { %v576_v34 = vmul.f32 %v1388_v3, %v532_v31  ;;  %v877_v42 = vpack.c.bf16 %v650_v1, %v648_v43 }
 0x250   :  { %876 = vmatprep.subr.msk.bf16.mxu1 %vm1414_vm2, %v874_v0  ;;  %v579_v10 = vmul.f32 %v1382_v7, %v535_v2  ;;  %v621_v16 = vadd.f32 %v1393_v56, %v577_v23  ;;  %v578_v44 = vmul.f32 %v1388_v3, %v534_v12  ;;  %v661_v3 = vpop.permute.xlu0 %660 }
 0x251   :  { %v620_v13 = vadd.f32 %v1396_v59, %v576_v34 }
 0x252   :  { %v623_v17 = vadd.f32 %v1393_v56, %v579_v10  ;;  %v622_v30 = vadd.f32 %v1396_v59, %v578_v44  ;;  %v653_v8 = vmax.f32 %v621_v16, 0.0 }
 0x253   :  { %878 = vmatpush1.bf16.xpose.msra.mxu1 %v877_v42  ;;  %v652_v20 = vmax.f32 %v620_v13, 0.0 }
 0x254   :  { %v655_v52 = vmax.f32 %v623_v17, 0.0  ;;  %v654_v15 = vmax.f32 %v622_v30, 0.0 }
 0x256   :  { %v879_v33 = vpack.c.bf16 %v655_v52, %v653_v8  ;;  %v882_v7 = vpack.c.bf16 %v654_v15, %v652_v20 }
 0x258   :  { %881 = vmatprep.subr.msk.bf16.mxu1 %vm1414_vm2, %v879_v33 }
 0x25b   :  { %883 = vmatpush1.bf16.xpose.msra.mxu1 %v882_v7 }
 0x262   :  { %788 = vmatmul.mubr.f32.vlgmr.msra.gmra.mrb[0].mxu1 %v1370_v19 }
 0x335   :  { %v789_v56 = vpop.f32.mrb[0].mxu1 }
 0x336   :  { %v790_v55 = vadd.f32 %v789_v56, %v661_v3  ;;  %v791_v39 = vpop.f32.mrb[1].mxu1 }
 0x338   :  { %793 = vst [vmem:[#allocation2] sm:$0x3] %v790_v55 }
 0x339   :  { %941 = shalt.err (!%p938_p4)
}
 0x33a   :  { %s942_s29 = scalar_lea.hbm %s1534_s7, 32 }
 0x33b   :  { %p943_p5 = scmp.ne.s32.totalorder %s1534_s7, %s942_s29  ;;  %p946_p6 = scmp.lt.u32.totalorder %s942_s29, %s1534_s7 }
 0x33d   :  { %p948_p7 = pnand %p946_p6, %p943_p5 }
 0x33f   :  { %951 = shalt.err (!%p948_p7)
}
 0x340   :  { %803 = dma.vmem_to_hbm [thread:$0]  %s801_s4, 32, %s1534_s7, [#allocation3]  }
 0x341   :  { %952 = dma.done.wait [#allocation3], 32  }
 0x342   :  { %953 = vsyncadd [#allocation3], 4294967264 }
 0x343   :  { %807 = vsyncpa [#allocation3], 1 }

</bundles_post_ra>
